<compile_context>
chip_gen: v7x
topology: tpu7x:2x2x1
jax: 0.10.0
libtpu: 0.0.40
codegen_flags: <defaults>
</compile_context>

<pallas_src>
import functools

import numpy as np
import jax
import jax.numpy as jnp
from jax.experimental import pallas as pl
from jax.experimental.pallas import tpu as pltpu


def _nearest_src_index(in_size, out_size):
    """Static nearest-neighbour source index / validity for one spatial axis."""
    coord = in_size * (np.arange(out_size, dtype=np.float64) + 0.5) / out_size
    idx = np.rint(coord).astype(np.int64)             # nearbyint, ties-to-even
    valid = (idx >= 0) & (idx < in_size)
    return np.clip(idx, 0, in_size - 1).astype(np.int64), valid


def _one_hot_selector(idx, valid, in_size, out_size, transpose=False):
    """One-hot gather matrix with zero-padding folded in as all-zero rows."""
    sel = np.zeros((out_size, in_size), np.float32)
    o = np.nonzero(valid)[0]
    sel[o, idx[o]] = 1.0
    return sel.T if transpose else sel


def _step_footprint_bytes(tb, Hin, Win, Hout, Wout, itemsize):
    data = 2 * tb * (Hin * Win + Hout * Wout)            # double-buffered in/out blocks
    sel = 2 * ((tb * Hout) * (tb * Hin) + Win * Wout)    # selectors (counted double-buffered)
    tmp = tb * Hout * Win                                 # row-gathered intermediate
    return (data + sel + tmp) * itemsize


def _pick_planes_per_step(B, Hin, Win, Hout, Wout, itemsize,
                          vmem_budget_bytes=12 * 1024 * 1024):
    """Largest plane count per grid step that keeps blocks sublane-aligned,
    fits the VMEM budget (rsel grows quadratically with TB, which caps it) and
    — when possible — leaves a grid of >= 2 parallel steps (v7x has 2 TCs)."""
    def aligned(tb):
        return tb == B or ((tb * Hin) % 8 == 0 and (tb * Hout) % 8 == 0)

    cands = [d for d in range(1, B + 1) if B % d == 0 and aligned(d)]
    if not cands:
        cands = [B]                      # full-array block: always layout-legal

    def fp(tb):
        return _step_footprint_bytes(tb, Hin, Win, Hout, Wout, itemsize)

    fitting = [tb for tb in cands if fp(tb) <= vmem_budget_bytes]
    if fitting:
        multi_step = [tb for tb in fitting if B // tb >= 2]
        tb = max(multi_step) if multi_step else max(fitting)
    else:
        tb = min(cands, key=fp)          # best effort; vmem_limit raised below
    return tb, fp(tb)


def _nearest_resize_kernel(precision, x_ref, rsel_ref, csel_ref, o_ref):
    """out = (rsel @ x) @ csel — two exact one-hot gathers on the MXU and one
    dense, lane-wide store per grid step (no per-row loops, no SMEM tables)."""
    rows = jnp.dot(rsel_ref[...], x_ref[...],
                   preferred_element_type=jnp.float32,
                   precision=precision).astype(csel_ref.dtype)
    o_ref[...] = jnp.dot(rows, csel_ref[...],
                         preferred_element_type=jnp.float32,
                         precision=precision).astype(o_ref.dtype)


def interpolate_grid_forward(x, output_shape, mode='nearest'):
    """Pallas implementation of InterpolateGrid.forward(x, output_shape)."""
    if mode != 'nearest':
        # TODO(synk): bilinear/bicubic grid_sample modes are not implemented.
        raise NotImplementedError("only mode='nearest' is implemented")

    N, C, Hin, Win = x.shape
    Hout, Wout = int(output_shape[0]), int(output_shape[1])
    B = N * C

    in_dtype = x.dtype
    if in_dtype == jnp.bfloat16:
        compute_dtype = jnp.bfloat16
        precision = None                        # one-hot gather is exact in bf16
    else:
        compute_dtype = jnp.float32
        precision = jax.lax.Precision.HIGHEST   # exact f32 copy through the bf16 MXU
    itemsize = jnp.dtype(compute_dtype).itemsize

    # Static nearest-neighbour index tables (shapes are static at trace time).
    ri, rvalid = _nearest_src_index(Hin, Hout)
    cj, cvalid = _nearest_src_index(Win, Wout)

    TB, footprint = _pick_planes_per_step(B, Hin, Win, Hout, Wout, itemsize)
    grid = (B // TB,)

    # Block-diagonal row selector over the TB planes of one grid step, plus the
    # shared column selector; invalid (zero-padded) output rows/cols are zero.
    rsel = np.kron(np.eye(TB, dtype=np.float32),
                   _one_hot_selector(ri, rvalid, Hin, Hout))           # (TB*Hout, TB*Hin)
    csel = _one_hot_selector(cj, cvalid, Win, Wout, transpose=True)    # (Win, Wout)

    # NCHW kept; planes are contiguous so this reshape is free (no transpose),
    # and bf16/f32 inputs take no dtype round-trip through HBM.
    x2d = x.reshape(B * Hin, Win).astype(compute_dtype)

    vmem_limit = int(min(max(32 * 1024 * 1024, 2 * footprint), 56 * 1024 * 1024))

    out2d = pl.pallas_call(
        functools.partial(_nearest_resize_kernel, precision),
        out_shape=jax.ShapeDtypeStruct((B * Hout, Wout), compute_dtype),
        grid=grid,
        in_specs=[
            pl.BlockSpec((TB * Hin, Win), lambda b: (b, 0)),         # TB input planes
            pl.BlockSpec((TB * Hout, TB * Hin), lambda b: (0, 0)),   # row selector (grid-invariant)
            pl.BlockSpec((Win, Wout), lambda b: (0, 0)),             # column selector (grid-invariant)
        ],
        out_specs=pl.BlockSpec((TB * Hout, Wout), lambda b: (b, 0)),
        compiler_params=pltpu.CompilerParams(
            dimension_semantics=("parallel",),
            vmem_limit_bytes=vmem_limit),
    )(
        x2d,
        jnp.asarray(rsel, dtype=compute_dtype),
        jnp.asarray(csel, dtype=compute_dtype),
    )

    return out2d.reshape(N, C, Hout, Wout).astype(in_dtype)


def interpolate_grid_reference(x, output_shape, half_r=True, half_c=True):
    """Literal numpy re-implementation of interpolate_grid_sample + F.grid_sample
    (mode='nearest', padding_mode='zeros', align_corners=False)."""
    x = np.asarray(x)
    N, C, Hin, Win = x.shape
    Hout, Wout = output_shape
    dr = 0.5 if half_r else 0.0
    dc = 0.5 if half_c else 0.0
    r = Hin * (np.arange(Hout, dtype=np.float64) + 0.5) / Hout + dr
    rn = 2 * (r / Hin - 0.5)
    c = Win * (np.arange(Wout, dtype=np.float64) + 0.5) / Wout + dc
    cn = 2 * (c / Win - 0.5)
    # grid_sample unnormalization with align_corners=False: ((g+1)*size - 1)/2
    iy = ((rn + 1) * Hin - 1) / 2
    ix = ((cn + 1) * Win - 1) / 2
    iyn = np.rint(iy).astype(np.int64)
    ixn = np.rint(ix).astype(np.int64)
    yv = (iyn >= 0) & (iyn < Hin)
    xv = (ixn >= 0) & (ixn < Win)
    iyc = np.clip(iyn, 0, Hin - 1)
    ixc = np.clip(ixn, 0, Win - 1)
    gathered = x[:, :, iyc, :][:, :, :, ixc]
    mask = (yv[:, None] & xv[None, :]).astype(x.dtype)
    return gathered * mask[None, None]


if __name__ == "__main__":
    key = jax.random.PRNGKey(0)
    configs = [
        ((2, 4, 16, 16), (32, 32), jnp.float32),      # 2x upsample (main demo shape)
        ((2, 16, 16, 128), (32, 256), jnp.bfloat16),  # lane-dense W, native-bf16 path, 2-step grid
        ((1, 3, 10, 20), (15, 40), jnp.float32),      # fractional scale, odd sizes (full-block path)
        ((2, 4, 16, 16), (8, 8), jnp.float32),        # downsample
    ]
    for shape, oshape, dtype in configs:
        key, sub = jax.random.split(key)
        x = jax.random.normal(sub, shape, dtype=jnp.float32)
        # Snap to bf16-representable values so the exact-copy check is independent
        # of how the MXU emulates f32 (and the native-bf16 path is loss-free too).
        x = x.astype(jnp.bfloat16).astype(dtype)

        out = jax.block_until_ready(interpolate_grid_forward(x, oshape))
        ref = interpolate_grid_reference(np.asarray(x, dtype=np.float32), oshape)

        assert out.shape == (shape[0], shape[1], oshape[0], oshape[1])
        assert out.dtype == x.dtype
        np.testing.assert_allclose(np.asarray(out, dtype=np.float32), ref,
                                   rtol=1e-6, atol=1e-6)

    print("KERNEL_OK")
</pallas_src>

<mosaic_0001>
module attributes {stable_mosaic.version = 11 : i64} {
  func.func @_nearest_resize_kernel(%arg0: i32, %arg1: memref<64x16xf32, #tpu.memory_space<vmem>>, %arg2: memref<128x64xf32, #tpu.memory_space<vmem>>, %arg3: memref<16x32xf32, #tpu.memory_space<vmem>>, %arg4: memref<128x32xf32, #tpu.memory_space<vmem>>) attributes {dimension_semantics = [#tpu.dimension_semantics<parallel>], iteration_bounds = array<i64: 2>, scalar_prefetch = 0 : i64, scratch_operands = 0 : i64, tpu.core_type = #tpu.core_type<tc>, window_params = [{transform_indices = @transform_0, window_bounds = array<i64: 64, 16>}, {pipeline_mode = #tpu.pipeline_mode<synchronous>, transform_indices = @transform_1, window_bounds = array<i64: 128, 64>}, {pipeline_mode = #tpu.pipeline_mode<synchronous>, transform_indices = @transform_2, window_bounds = array<i64: 16, 32>}, {transform_indices = @transform_3, window_bounds = array<i64: 128, 32>}]} {
    %c0 = arith.constant 0 : index
    %c0_0 = arith.constant 0 : index
    %0 = vector.load %arg2[%c0, %c0_0] : memref<128x64xf32, #tpu.memory_space<vmem>>, vector<128x64xf32>
    %c0_1 = arith.constant 0 : index
    %c0_2 = arith.constant 0 : index
    %1 = vector.load %arg1[%c0_1, %c0_2] : memref<64x16xf32, #tpu.memory_space<vmem>>, vector<64x16xf32>
    %cst = arith.constant dense<0.000000e+00> : vector<128x16xf32>
    %2 = tpu.matmul %0, %1, %cst {dimension_numbers = #tpu.dot_dimension_numbers<[1], [0], [0], [1], [0, 0, 1, 1], [], []>, precision = #tpu.contract_precision<fp32>} : vector<128x64xf32>, vector<64x16xf32>, vector<128x16xf32> -> vector<128x16xf32>
    %c0_3 = arith.constant 0 : index
    %c0_4 = arith.constant 0 : index
    %3 = vector.load %arg3[%c0_3, %c0_4] : memref<16x32xf32, #tpu.memory_space<vmem>>, vector<16x32xf32>
    %cst_5 = arith.constant dense<0.000000e+00> : vector<128x32xf32>
    %4 = tpu.matmul %2, %3, %cst_5 {dimension_numbers = #tpu.dot_dimension_numbers<[1], [0], [0], [1], [0, 0, 1, 1], [], []>, precision = #tpu.contract_precision<fp32>} : vector<128x16xf32>, vector<16x32xf32>, vector<128x32xf32> -> vector<128x32xf32>
    %c0_6 = arith.constant 0 : index
    %c0_7 = arith.constant 0 : index
    %5 = vector.load %arg4[%c0_6, %c0_7] : memref<128x32xf32, #tpu.memory_space<vmem>>, vector<128x32xf32>
    tpu.vector_store %arg4[%c0_6, %c0_7], %4 {strides = array<i32>} : memref<128x32xf32, #tpu.memory_space<vmem>>, vector<128x32xf32>,
    return
  }
  func.func @transform_0(%arg0: i32) -> (i32, i32) {
    %c0_i32 = arith.constant 0 : i32
    %c0_i32_0 = arith.constant 0 : i32
    return %arg0, %c0_i32 : i32, i32
  }
  func.func @transform_1(%arg0: i32) -> (i32, i32) {
    %c0_i32 = arith.constant 0 : i32
    %c0_i32_0 = arith.constant 0 : i32
    %c0_i32_1 = arith.constant 0 : i32
    return %c0_i32, %c0_i32_0 : i32, i32
  }
  func.func @transform_2(%arg0: i32) -> (i32, i32) {
    %c0_i32 = arith.constant 0 : i32
    %c0_i32_0 = arith.constant 0 : i32
    %c0_i32_1 = arith.constant 0 : i32
    return %c0_i32, %c0_i32_0 : i32, i32
  }
  func.func @transform_3(%arg0: i32) -> (i32, i32) {
    %c0_i32 = arith.constant 0 : i32
    %c0_i32_0 = arith.constant 0 : i32
    return %arg0, %c0_i32 : i32, i32
  }
}

</mosaic_0001>

<bundles_post_ra>
// kernel: tpu_custom_call.1
= control target key start
LH: loop header
LB: loop body
LE: loop exit
PB: predicated region body
PF: predicated region fallthrough
CT: control target
= control target key end

     0   :  { %s3644_s12 = smov 0   ;;  %s4431_s0 = inlined_call_operand.vmem [shape: f32[128,16], index: 0, kind: input, shape index: {}]   ;;  %s4432_s1 = inlined_call_operand.vmem [shape: f32[128,64], index: 1, kind: input, shape index: {}]   ;;  %s4433_s2 = inlined_call_operand.vmem [shape: f32[16,32], index: 2, kind: input, shape index: {}]   ;;  %s4434_s3 = inlined_call_operand.vmem [shape: f32[256,32], index: 3, kind: output, shape index: {}]  }
   0x1 LB: > { %s2657_s13 = sadd.s32 4294967295, %s3622_s12   ;;  %p2661_p0 = scmp.ge.s32.totalorder %s3622_s12, 1  ;;  %s3622_s12 = sphi %s3644_s12, %s13_s12  }
   0x2   : > { %p138_p1 = scmp.lt.s32.totalorder %s3622_s12, 3 }
   0x4   : > { %p139_p2 = pnand %p2661_p0, %p138_p1 }
   0x5   : > { %s2662_s14 = sshll.u32 (!%p139_p2), %s2657_s13, 3  ;;  %v174_v0 = vld [vmem:[%s4432_s1] sm:$0xff] (!%p139_p2)  ;;  %vm198_vm0 = vcmask (!%p139_p2), 523264   ;;  %v175_v1 = vld [vmem:[%s4432_s1 + $0x8] sm:$0xff] (!%p139_p2)  ;;  %v176_v2 = vld [vmem:[%s4432_s1 + $0x10] sm:$0xff] (!%p139_p2)  ;;  %vm1431_vm1 = vcmask (!%p139_p2), 130048  }
   0x6   : > { %142 = sbr.rel (%p139_p2) target bundleno = 824 (0x338), region = 32  ;;  %p163_p3 = scmp.lt.s32.totalorder (!%p139_p2), %s2662_s14, 15  ;;  %v200_v3 = vsel (!%p139_p2), %vm198_vm0, %v174_v0, 0  ;;  %v203_v4 = vsel (!%p139_p2), %vm198_vm0, %v175_v1, 0  ;;  %v177_v5 = vld [vmem:[%s4432_s1 + $0x18] sm:$0xff] (!%p139_p2)  ;;  %v206_v7 = vsel (!%p139_p2), %vm198_vm0, %v176_v2, 0 }
   0x7   : > { %v3668_v6 = vand.u32 (!%p139_p2), 4294901760, %v200_v3  ;;  %v3671_v8 = vand.u32 (!%p139_p2), 4294901760, %v203_v4  ;;  %v178_v9 = vld [vmem:[%s4432_s1 + $0x20] sm:$0xff] (!%p139_p2)  ;;  %v209_v11 = vsel (!%p139_p2), %vm198_vm0, %v177_v5, 0  ;;  %v179_v12 = vld [vmem:[%s4432_s1 + $0x28] sm:$0xff] (!%p139_p2)  ;;  %v3683_v13 = vand.u32 (!%p139_p2), 4294901760, %v206_v7 }
   0x8   : > { %v212_v15 = vsel (!%p139_p2), %vm198_vm0, %v178_v9, 0  ;;  %v180_v16 = vld [vmem:[%s4432_s1 + $0x30] sm:$0xff] (!%p139_p2)  ;;  %v3696_v21 = vand.u32 (!%p139_p2), 4294901760, %v209_v11  ;;  %v215_v22 = vsel (!%p139_p2), %vm198_vm0, %v179_v12, 0  ;;  %v181_v34 = vld [vmem:[%s4432_s1 + $0x38] sm:$0xff] (!%p139_p2)  ;;  %v182_v61 = vld [vmem:[%s4432_s1 + $0x40] sm:$0xff] (!%p139_p2) }
   0x9   : > { %v3677_v10 = vsub.f32 (!%p139_p2), %v200_v3, %v3668_v6  ;;  %v3694_v20 = vsub.f32 (!%p139_p2), %v203_v4, %v3671_v8  ;;  %v3707_v31 = vsub.f32 (!%p139_p2), %v206_v7, %v3683_v13  ;;  %v3709_v32 = vand.u32 (!%p139_p2), 4294901760, %v212_v15  ;;  %v183_v2 = vld [vmem:[%s4432_s1 + $0x48] sm:$0xff] (!%p139_p2) }
   0xa   : > { %v218_v33 = vsel (!%p139_p2), %vm198_vm0, %v180_v16, 0  ;;  %v3728_v43 = vsub.f32 (!%p139_p2), %v209_v11, %v3696_v21  ;;  %v3730_v44 = vand.u32 (!%p139_p2), 4294901760, %v215_v22  ;;  %v221_v48 = vsel (!%p139_p2), %vm198_vm0, %v181_v34, 0  ;;  %v185_v34 = vld [vmem:[%s4432_s1 + $0x58] sm:$0xff] (!%p139_p2) }
   0xb   : > { %v4440_v14 = vand.u32 (!%p139_p2), 4294901760, %v3677_v10  ;;  %v4439_v45 = vand.u32 (!%p139_p2), 4294901760, %v3694_v20  ;;  %v3736_v47 = vand.u32 (!%p139_p2), 4294901760, %v218_v33  ;;  %v4438_v55 = vand.u32 (!%p139_p2), 4294901760, %v3707_v31 }
   0xc   : > { %v4436_v58 = vand.u32 (!%p139_p2), 4294901760, %v3728_v43  ;;  %v3757_v59 = vsub.f32 (!%p139_p2), %v212_v15, %v3709_v32  ;;  %v3770_v0 = vsub.f32 (!%p139_p2), %v215_v22, %v3730_v44  ;;  %v3786_v5 = vand.u32 (!%p139_p2), 4294901760, %v221_v48 }
   0xd   : > { %s4470_s14 = smov (!%p163_p3, %s2662_s14), 15  ;;  %v323_v29 = vsub.f32 %v3677_v10, %v4440_v14  ;;  %v333_v62 = vsub.f32 %v3694_v20, %v4439_v45  ;;  %v224_v12 = vsel %vm198_vm0, %v182_v61, 0  ;;  %v343_v15 = vsub.f32 %v3707_v31, %v4438_v55 }
   0xe   : > { %s2663_s27 = sshll.u32 %s4470_s14, 3  ;;  %v3797_v16 = vsub.f32 %v218_v33, %v3736_v47  ;;  %vm2584_vm2 = vcmask 261120  }
   0xf   : > { %s166_s30 = scalar_lea.vmem %s4431_s0, %s2663_s27  ;;  %v324_v40 = vand.u32 4294901760, %v323_v29  ;;  %v334_v22 = vand.u32 4294901760, %v333_v62  ;;  %v3812_v29 = vsub.f32 %v221_v48, %v3786_v5 }
  0x10   : > { %v190_v17 = vld [vmem:[%s166_s30] sm:$0xff]  ;;  %v191_v18 = vld [vmem:[%s166_s30 + $0x8] sm:$0xff]  ;;  %v192_v19 = vld [vmem:[%s166_s30 + $0x10] sm:$0xff] }
  0x11   : > { %v248_v23 = vand.u32 4294901760, %v190_v17  ;;  %v251_v24 = vand.u32 4294901760, %v191_v18  ;;  %v193_v25 = vld [vmem:[%s166_s30 + $0x18] sm:$0xff]  ;;  %v254_v26 = vand.u32 4294901760, %v192_v19  ;;  %v3699_v27 = vld [vmem:[%s166_s30 + $0x20] sm:$0xff]  ;;  %v3701_v28 = vld [vmem:[%s166_s30 + $0x28] sm:$0xff]  ;;  %2936 = vmatprep.mubr.f32.mxu0 %v324_v40 }
  0x12   : > { %v257_v30 = vand.u32 4294901760, %v193_v25  ;;  %v260_v36 = vand.u32 4294901760, %v3699_v27  ;;  %v263_v37 = vand.u32 4294901760, %v3701_v28  ;;  %v3719_v38 = vld [vmem:[%s166_s30 + $0x30] sm:$0xff]  ;;  %v3721_v39 = vld [vmem:[%s166_s30 + $0x38] sm:$0xff]  ;;  %s2664_s30 = sshll.u32 %s2657_s13, 4 }
  0x13   : > { %v3715_v35 = vpack.c.bf16 %v251_v24, %v248_v23  ;;  %v3725_v42 = vsub.f32 %v190_v17, %v248_v23  ;;  %v3734_v46 = vsub.f32 %v191_v18, %v251_v24  ;;  %v266_v49 = vand.u32 4294901760, %v3719_v38  ;;  %p169_p4 = scmp.lt.s32.totalorder %s2664_s30, 31 }
  0x14   : > { %v3723_v41 = vpack.c.bf16 %v257_v30, %v254_v26  ;;  %v269_v50 = vand.u32 4294901760, %v3721_v39  ;;  %v3743_v52 = vsub.f32 %v192_v19, %v254_v26  ;;  %v3746_v53 = vpack.c.bf16 %v263_v37, %v260_v36  ;;  %v184_v19 = vld [vmem:[%s4432_s1 + $0x50] sm:$0xff] }
  0x15   : > { %3329 = vmatprep.subr.bf16.mxu0 %v3715_v35  ;;  %v483_v51 = vand.u32 4294901760, %v3725_v42  ;;  %v4448_v54 = vand.u32 4294901760, %v3734_v46  ;;  %v3750_v56 = vsub.f32 %v193_v25, %v257_v30  ;;  %v3799_v17 = vand.u32 4294901760, %v224_v12  ;;  %s4472_s30 = smov (!%p169_p4, %s2664_s30), 31 }
  0x16   : > { %3331 = vmatpush3.bf16.msra.mxu0 %v3715_v35  ;;  %v4447_v60 = vand.u32 4294901760, %v3743_v52  ;;  %v3781_v3 = vpack.c.bf16 %v269_v50, %v266_v49  ;;  %v227_v18 = vsel %vm198_vm0, %v183_v2, 0  ;;  %v353_v23 = vsub.f32 %v3728_v43, %v4436_v58  ;;  %s2665_s4 = sshll.u32 %s4472_s30, 3 }
  0x17   : > { %3333 = vmatprep.subr.bf16.mxu0 %v3723_v41  ;;  %v484_v57 = vsub.f32 %v3725_v42, %v483_v51  ;;  %v491_v63 = vsub.f32 %v3734_v46, %v4448_v54  ;;  %v4446_v1 = vand.u32 4294901760, %v3750_v56  ;;  %v4435_v24 = vand.u32 4294901760, %v3757_v59  ;;  %s4394_s7 = scalar_lea.vmem %s4434_s3, %s2665_s4 }
  0x18   : > { %v498_v4 = vsub.f32 %v3743_v52, %v4447_v60  ;;  %v4437_v25 = vand.u32 4294901760, %v3770_v0  ;;  %v3815_v30 = vsub.f32 %v3699_v27, %v260_v36  ;;  %v3818_v33 = vsub.f32 %v3701_v28, %v263_v37  ;;  %v186_v27 = vld [vmem:[%s4432_s1 + $0x60] sm:$0xff] }
  0x19   : > { %v485_v7 = vand.u32 4294901760, %v484_v57  ;;  %v492_v9 = vand.u32 4294901760, %v491_v63  ;;  %v505_v11 = vsub.f32 %v3750_v56, %v4446_v1  ;;  %v3824_v61 = vand.u32 4294901760, %v227_v18 }
  0x1a   : > { %3335 = vmatpush3.bf16.msra.mxu0 %v3723_v41  ;;  %v499_v26 = vand.u32 4294901760, %v498_v4  ;;  %v230_v62 = vsel %vm198_vm0, %v184_v19, 0  ;;  %v344_v36 = vand.u32 4294901760, %v343_v15  ;;  %v3831_v28 = vsub.f32 %v224_v12, %v3799_v17 }
  0x1b   : > { %3337 = vmatprep.subr.bf16.mxu0 %v3746_v53  ;;  %v3344_v40 = vpack.c.bf16 %v492_v9, %v485_v7  ;;  %v506_v57 = vand.u32 4294901760, %v505_v11  ;;  %v4441_v37 = vand.u32 4294901760, %v3815_v30  ;;  %v4442_v48 = vand.u32 4294901760, %v3818_v33 }
  0x1c   : > { %v363_v63 = vsub.f32 %v3757_v59, %v4435_v24  ;;  %v4445_v2 = vand.u32 4294901760, %v3797_v16  ;;  %v3839_v4 = vand.u32 4294901760, %v230_v62  ;;  %v233_v7 = vsel %vm198_vm0, %v185_v34, 0 }
  0x1d   : > { %v373_v9 = vsub.f32 %v3770_v0, %v4437_v25  ;;  %v512_v11 = vsub.f32 %v3815_v30, %v4441_v37  ;;  %v519_v12 = vsub.f32 %v3818_v33, %v4442_v48  ;;  %v236_v15 = vsel %vm198_vm0, %v186_v27, 0  ;;  %v187_v25 = vld [vmem:[%s4432_s1 + $0x68] sm:$0xff] }
  0x1e   : > { %3339 = vmatpush3.bf16.msra.mxu0 %v3746_v53  ;;  %v354_v19 = vand.u32 4294901760, %v353_v23  ;;  %v3348_v24 = vpack.c.bf16 %v506_v57, %v499_v26  ;;  %v4444_v34 = vand.u32 4294901760, %v3812_v29  ;;  %v3855_v58 = vsub.f32 %v227_v18, %v3824_v61  ;;  %v188_v23 = vld [vmem:[%s4432_s1 + $0x70] sm:$0xff] }
  0x1f   : > { %3341 = vmatprep.subr.bf16.mxu0 %v3781_v3  ;;  %v4443_v55 = vand.u32 4294901760, %v3831_v28  ;;  %v513_v45 = vand.u32 4294901760, %v512_v11  ;;  %v520_v14 = vand.u32 4294901760, %v519_v12  ;;  %v3861_v37 = vand.u32 4294901760, %v233_v7 }
  0x20   : > { %v364_v26 = vand.u32 4294901760, %v363_v63  ;;  %v383_v18 = vsub.f32 %v3797_v16, %v4445_v2  ;;  %v3870_v57 = vsub.f32 %v230_v62, %v3839_v4  ;;  %v3872_v27 = vand.u32 4294901760, %v236_v15 }
  0x21   : > { %v374_v11 = vand.u32 4294901760, %v373_v9  ;;  %v239_v12 = vsel %vm198_vm0, %v187_v25, 0  ;;  %v3878_v48 = vsub.f32 %v3719_v38, %v266_v49  ;;  %v393_v62 = vsub.f32 %v3812_v29, %v4444_v34  ;;  %v189_v38 = vld [vmem:[%s4432_s1 + $0x78] sm:$0xff] }
  0x22   : > { %3343 = vmatpush3.bf16.msra.mxu0 %v3781_v3  ;;  %v242_v25 = vsel %vm198_vm0, %v188_v23, 0  ;;  %v403_v49 = vsub.f32 %v3831_v28, %v4443_v55  ;;  %v384_v9 = vand.u32 4294901760, %v383_v18  ;;  %v3905_v23 = vand.u32 4294901760, %v239_v12 }
  0x23   : > { %3345 = vmatprep.subr.bf16.mxu0 %v3344_v40  ;;  %v3909_v34 = vand.u32 4294901760, %v242_v25  ;;  %v245_v2 = vsel %vm198_vm0, %v189_v38, 0  ;;  %v394_v1 = vand.u32 4294901760, %v393_v62  ;;  %v4451_v62 = vand.u32 4294901760, %v3734_v46 }
  0x24   : > { %v3920_v54 = vsub.f32 %v239_v12, %v3905_v23  ;;  %v3922_v38 = vand.u32 4294901760, %v245_v2  ;;  %v4453_v12 = vand.u32 4294901760, %v3750_v56  ;;  %v3360_v18 = vpack.c.bf16 %v3734_v46, %v3725_v42 }
  0x25   : > { %2937 = vmatmul.mubr.f32.vlgmr.msra.gmra.mrb[0].mxu0 %v334_v22  ;;  %v3883_v22 = vsub.f32 %v3721_v39, %v269_v50  ;;  %v3897_v39 = vsub.f32 %v233_v7, %v3861_v37  ;;  %v525_v50 = vand.u32 4294901760, %v3878_v48 }
  0x26   : > { %3347 = vmatpush3.bf16.msra.mxu0 %v3344_v40  ;;  %2939 = vmatprep.mubr.f32.mxu0 %v344_v36  ;;  %v4449_v40 = vand.u32 4294901760, %v3855_v58  ;;  %v3352_v36 = vpack.c.bf16 %v520_v14, %v513_v45  ;;  %v4450_v14 = vand.u32 4294901760, %v3870_v57  ;;  %v3903_v45 = vsub.f32 %v236_v15, %v3872_v27 }
  0x27   : > { %3349 = vmatprep.subr.bf16.mxu0 %v3348_v24  ;;  %v532_v63 = vand.u32 4294901760, %v3883_v22  ;;  %v526_v55 = vsub.f32 %v3878_v48, %v525_v50  ;;  %v404_v15 = vand.u32 4294901760, %v403_v49  ;;  %v3932_v49 = vsub.f32 %v242_v25, %v3909_v34 }
  0x28   : > { %v4456_v25 = vand.u32 4294901760, %v3897_v39 }
  0x29   : > { %2940 = vmatmul.mubr.f32.gmra.mrb[2].mxu0 %v354_v19  ;;  %v533_v7 = vsub.f32 %v3883_v22, %v532_v63  ;;  %v413_v19 = vsub.f32 %v3855_v58, %v4449_v40  ;;  %v527_v60 = vand.u32 4294901760, %v526_v55  ;;  %v3928_v40 = vpack.c.bf16 %v4451_v62, %v483_v51 }
  0x2a   : > { %2942 = vmatprep.mubr.f32.mxu0 %v364_v26  ;;  %3351 = vmatpush3.bf16.msra.mxu0 %v3348_v24  ;;  %v423_v24 = vsub.f32 %v3870_v57, %v4450_v14  ;;  %v442_v55 = vand.u32 4294901760, %v3903_v45  ;;  %v4454_v51 = vand.u32 4294901760, %v3815_v30  ;;  %v3948_v62 = vpack.c.bf16 %v532_v63, %v525_v50 }
  0x2b   : > { %3353 = vmatprep.subr.bf16.mxu0 %v3352_v36  ;;  %v534_v26 = vand.u32 4294901760, %v533_v7  ;;  %v4452_v7 = vand.u32 4294901760, %v3743_v52  ;;  %v462_v50 = vand.u32 4294901760, %v3932_v49 }
  0x2c   : > { %v424_v42 = vand.u32 4294901760, %v423_v24  ;;  %v443_v46 = vsub.f32 %v3903_v45, %v442_v55 }
  0x2d   : > { %2943 = vmatmul.mubr.f32.gmra.mrb[4].mxu0 %v374_v11  ;;  %v3356_v11 = vpack.c.bf16 %v534_v26, %v527_v60  ;;  %v3938_v14 = vpack.c.bf16 %v4453_v12, %v4452_v7  ;;  %v414_v60 = vand.u32 4294901760, %v413_v19  ;;  %v433_v26 = vsub.f32 %v3897_v39, %v4456_v25 }
  0x2e   : > { %2945 = vmatprep.mubr.f32.mxu0 %v384_v9  ;;  %3355 = vmatpush3.bf16.msra.mxu0 %v3352_v36  ;;  %v4455_v9 = vand.u32 4294901760, %v3818_v33  ;;  %v452_v7 = vand.u32 4294901760, %v3920_v54  ;;  %v3955_v12 = vsub.f32 %v245_v2, %v3922_v38  ;;  %v444_v2 = vand.u32 4294901760, %v443_v46 }
  0x2f   : > { %3357 = vmatprep.subr.bf16.mxu0 %v3356_v11  ;;  %v3368_v25 = vpack.c.bf16 %v3818_v33, %v3815_v30  ;;  %v4459_v30 = vand.u32 4294901760, %v3707_v31  ;;  %v4460_v33 = vand.u32 4294901760, %v3728_v43 }
  0x30   : > { %v3946_v36 = vpack.c.bf16 %v4455_v9, %v4454_v51  ;;  %v453_v63 = vsub.f32 %v3920_v54, %v452_v7  ;;  %v472_v19 = vand.u32 4294901760, %v3955_v12 }
  0x31   : > { %2946 = vmatmul.mubr.f32.gmra.mrb[6].mxu0 %v394_v1  ;;  %v434_v1 = vand.u32 4294901760, %v433_v26  ;;  %v3372_v26 = vpack.c.bf16 %v3883_v22, %v3878_v48  ;;  %v4461_v48 = vand.u32 4294901760, %v3757_v59 }
  0x32   : > { %2948 = vmatprep.mubr.f32.mxu0 %v404_v15  ;;  %3359 = vmatpush3.bf16.msra.mxu0 %v3356_v11  ;;  %v463_v15 = vsub.f32 %v3932_v49, %v462_v50  ;;  %v454_v24 = vand.u32 4294901760, %v453_v63  ;;  %v473_v11 = vsub.f32 %v3955_v12, %v472_v19 }
  0x33   : > { %3361 = vmatprep.subr.bf16.mxu0 %v3360_v18 }
  0x34   : > { %v464_v51 = vand.u32 4294901760, %v463_v15  ;;  %v474_v9 = vand.u32 4294901760, %v473_v11 }
  0x35   : > { %2949 = vmatmul.mubr.f32.gmra.mrb[8].mxu0 %v414_v60  ;;  %v3364_v60 = vpack.c.bf16 %v3750_v56, %v3743_v52  ;;  %v4457_v52 = vand.u32 4294901760, %v3677_v10  ;;  %v4458_v56 = vand.u32 4294901760, %v3694_v20 }
  0x36   : > { %2951 = vmatprep.mubr.f32.mxu0 %v424_v42 }
  0x39   : > { %2952 = vmatmul.mubr.f32.gmra.mrb[10].mxu0 %v434_v1 }
  0x3a   : > { %2954 = vmatprep.mubr.f32.mxu0 %v444_v2 }
  0x3d   : > { %2955 = vmatmul.mubr.f32.gmra.mrb[12].mxu0 %v454_v24 }
  0x3e   : > { %2957 = vmatprep.mubr.f32.mxu0 %v464_v51 }
  0x41   : > { %2958 = vmatmul.mubr.f32.gmra.mrb[14].mxu0 %v474_v9 }
  0x42   : > { %2976 = vmatprep.mubr.f32.mxu0 %v3668_v6 }
  0x45   : > { %2977 = vmatmul.mubr.f32.vlgmr.msra.gmra.mrb[0].mxu0 %v3671_v8 }
  0x46   : > { %3363 = vmatpush3.bf16.msra.mxu0 %v3360_v18  ;;  %2979 = vmatprep.mubr.f32.mxu0 %v3683_v13 }
  0x47   : > { %3365 = vmatprep.subr.bf16.mxu0 %v3364_v60 }
  0x49   : > { %2980 = vmatmul.mubr.f32.gmra.mrb[2].mxu0 %v3696_v21 }
  0x4a   : > { %2982 = vmatprep.mubr.f32.mxu0 %v3709_v32  ;;  %3367 = vmatpush3.bf16.msra.mxu0 %v3364_v60 }
  0x4b   : > { %3369 = vmatprep.subr.bf16.mxu0 %v3368_v25 }
  0x4d   : > { %2983 = vmatmul.mubr.f32.gmra.mrb[4].mxu0 %v3730_v44 }
  0x4e   : > { %2985 = vmatprep.mubr.f32.mxu0 %v3736_v47  ;;  %3371 = vmatpush3.bf16.msra.mxu0 %v3368_v25 }
  0x4f   : > { %3373 = vmatprep.subr.bf16.mxu0 %v3372_v26 }
  0x51   : > { %2986 = vmatmul.mubr.f32.gmra.mrb[6].mxu0 %v3786_v5 }
  0x52   : > { %2988 = vmatprep.mubr.f32.mxu0 %v3799_v17  ;;  %3375 = vmatpush3.bf16.msra.mxu0 %v3372_v26 }
  0x53   : > { %3377 = vmatprep.subr.bf16.mxu0 %v3715_v35 }
  0x55   : > { %2989 = vmatmul.mubr.f32.gmra.mrb[8].mxu0 %v3824_v61 }
  0x56   : > { %2991 = vmatprep.mubr.f32.mxu0 %v3839_v4 }
  0x59   : > { %2992 = vmatmul.mubr.f32.gmra.mrb[10].mxu0 %v3861_v37 }
  0x5a   : > { %2994 = vmatprep.mubr.f32.mxu0 %v3872_v27 }
  0x5d   : > { %2995 = vmatmul.mubr.f32.gmra.mrb[12].mxu0 %v3905_v23 }
  0x5e   : > { %2997 = vmatprep.mubr.f32.mxu0 %v3909_v34 }
  0x61   : > { %2998 = vmatmul.mubr.f32.gmra.mrb[14].mxu0 %v3922_v38 }
  0x62   : > { %3016 = vmatprep.mubr.f32.mxu0 %v3677_v10  ;;  %v4462_v10 = vand.u32 4294901760, %v3770_v0 }
  0x65   : > { %3017 = vmatmul.mubr.f32.vlgmr.msra.gmra.mrb[0].mxu0 %v3694_v20  ;;  %v4463_v20 = vand.u32 4294901760, %v3797_v16 }
  0x66   : > { %3379 = vmatpush3.bf16.msra.mxu0 %v3715_v35  ;;  %3019 = vmatprep.mubr.f32.mxu0 %v3707_v31  ;;  %v4464_v31 = vand.u32 4294901760, %v3812_v29 }
  0x67   : > { %3381 = vmatprep.subr.bf16.mxu0 %v3723_v41 }
  0x69   : > { %3020 = vmatmul.mubr.f32.gmra.mrb[2].mxu0 %v3728_v43  ;;  %v4465_v43 = vand.u32 4294901760, %v3831_v28 }
  0x6a   : > { %3022 = vmatprep.mubr.f32.mxu0 %v3757_v59  ;;  %3383 = vmatpush3.bf16.msra.mxu0 %v3723_v41  ;;  %v4466_v59 = vand.u32 4294901760, %v3855_v58 }
  0x6b   : > { %3385 = vmatprep.subr.bf16.mxu0 %v3746_v53 }
  0x6d   : > { %3023 = vmatmul.mubr.f32.gmra.mrb[4].mxu0 %v3770_v0  ;;  %v4467_v0 = vand.u32 4294901760, %v3870_v57 }
  0x6e   : > { %3025 = vmatprep.mubr.f32.mxu0 %v3797_v16  ;;  %3387 = vmatpush3.bf16.msra.mxu0 %v3746_v53  ;;  %v4468_v16 = vand.u32 4294901760, %v3897_v39 }
  0x6f   : > { %3389 = vmatprep.subr.bf16.mxu0 %v3781_v3 }
  0x71   : > { %3026 = vmatmul.mubr.f32.gmra.mrb[6].mxu0 %v3812_v29 }
  0x72   : > { %3028 = vmatprep.mubr.f32.mxu0 %v3831_v28  ;;  %3391 = vmatpush3.bf16.msra.mxu0 %v3781_v3 }
  0x73   : > { %3393 = vmatprep.subr.bf16.mxu0 %v3928_v40 }
  0x75   : > { %3029 = vmatmul.mubr.f32.gmra.mrb[8].mxu0 %v3855_v58 }
  0x76   : > { %3031 = vmatprep.mubr.f32.mxu0 %v3870_v57 }
  0x79   : > { %3032 = vmatmul.mubr.f32.gmra.mrb[10].mxu0 %v3897_v39 }
  0x7a   : > { %3034 = vmatprep.mubr.f32.mxu0 %v3903_v45 }
  0x7d   : > { %3035 = vmatmul.mubr.f32.gmra.mrb[12].mxu0 %v3920_v54 }
  0x7e   : > { %3037 = vmatprep.mubr.f32.mxu0 %v3932_v49 }
  0x81   : > { %3038 = vmatmul.mubr.f32.gmra.mrb[14].mxu0 %v3955_v12 }
  0x82   : > { %3056 = vmatprep.mubr.f32.mxu0 %v4457_v52 }
  0x85   : > { %3057 = vmatmul.mubr.f32.vlgmr.msra.gmra.mrb[0].mxu0 %v4458_v56 }
  0x86   : > { %3395 = vmatpush3.bf16.msra.mxu0 %v3928_v40  ;;  %3059 = vmatprep.mubr.f32.mxu0 %v4459_v30 }
  0x87   : > { %3397 = vmatprep.subr.bf16.mxu0 %v3938_v14 }
  0x89   : > { %3060 = vmatmul.mubr.f32.gmra.mrb[2].mxu0 %v4460_v33 }
  0x8a   : > { %3062 = vmatprep.mubr.f32.mxu0 %v4461_v48  ;;  %3399 = vmatpush3.bf16.msra.mxu0 %v3938_v14 }
  0x8b   : > { %3401 = vmatprep.subr.bf16.mxu0 %v3946_v36 }
  0x8d   : > { %3063 = vmatmul.mubr.f32.gmra.mrb[4].mxu0 %v4462_v10 }
  0x8e   : > { %3065 = vmatprep.mubr.f32.mxu0 %v4463_v20  ;;  %3403 = vmatpush3.bf16.msra.mxu0 %v3946_v36 }
  0x8f   : > { %3405 = vmatprep.subr.bf16.mxu0 %v3948_v62 }
  0x91   : > { %3066 = vmatmul.mubr.f32.gmra.mrb[6].mxu0 %v4464_v31 }
  0x92   : > { %3068 = vmatprep.mubr.f32.mxu0 %v4465_v43  ;;  %3407 = vmatpush3.bf16.msra.mxu0 %v3948_v62 }
  0x93   : > { %3409 = vmatprep.subr.bf16.mxu0 %v3715_v35 }
  0x95   : > { %3069 = vmatmul.mubr.f32.gmra.mrb[8].mxu0 %v4466_v59 }
  0x96   : > { %3071 = vmatprep.mubr.f32.mxu0 %v4467_v0 }
  0x99   : > { %3072 = vmatmul.mubr.f32.gmra.mrb[10].mxu0 %v4468_v16 }
  0x9a   : > { %3074 = vmatprep.mubr.f32.mxu0 %v442_v55 }
  0x9d   : > { %3075 = vmatmul.mubr.f32.gmra.mrb[12].mxu0 %v452_v7 }
  0x9e   : > { %3077 = vmatprep.mubr.f32.mxu0 %v462_v50 }
  0xa1   : > { %3078 = vmatmul.mubr.f32.gmra.mrb[14].mxu0 %v472_v19 }
  0xa2   : > { %3096 = vmatprep.mubr.f32.mxu0 %v3668_v6 }
  0xa5   : > { %3097 = vmatmul.mubr.f32.vlgmr.msra.gmra.mrb[0].mxu0 %v3671_v8 }
  0xa6   : > { %3411 = vmatpush3.bf16.msra.mxu0 %v3715_v35  ;;  %3099 = vmatprep.mubr.f32.mxu0 %v3683_v13 }
  0xa7   : > { %3413 = vmatprep.subr.bf16.mxu0 %v3723_v41 }
  0xa9   : > { %3100 = vmatmul.mubr.f32.gmra.mrb[2].mxu0 %v3696_v21 }
  0xaa   : > { %3102 = vmatprep.mubr.f32.mxu0 %v3709_v32  ;;  %3415 = vmatpush3.bf16.msra.mxu0 %v3723_v41 }
  0xab   : > { %3417 = vmatprep.subr.bf16.mxu0 %v3746_v53 }
  0xad   : > { %3103 = vmatmul.mubr.f32.gmra.mrb[4].mxu0 %v3730_v44 }
  0xae   : > { %3105 = vmatprep.mubr.f32.mxu0 %v3736_v47  ;;  %3419 = vmatpush3.bf16.msra.mxu0 %v3746_v53 }
  0xaf   : > { %3421 = vmatprep.subr.bf16.mxu0 %v3781_v3 }
  0xb1   : > { %3106 = vmatmul.mubr.f32.gmra.mrb[6].mxu0 %v3786_v5 }
  0xb2   : > { %3108 = vmatprep.mubr.f32.mxu0 %v3799_v17  ;;  %3423 = vmatpush3.bf16.msra.mxu0 %v3781_v3 }
  0xb5   : > { %3109 = vmatmul.mubr.f32.gmra.mrb[8].mxu0 %v3824_v61 }
  0xb6   : > { %3111 = vmatprep.mubr.f32.mxu0 %v3839_v4 }
  0xb9   : > { %3112 = vmatmul.mubr.f32.gmra.mrb[10].mxu0 %v3861_v37 }
  0xba   : > { %3114 = vmatprep.mubr.f32.mxu0 %v3872_v27 }
  0xbd   : > { %3115 = vmatmul.mubr.f32.gmra.mrb[12].mxu0 %v3905_v23 }
  0xbe   : > { %3117 = vmatprep.mubr.f32.mxu0 %v3909_v34 }
  0xc1   : > { %3118 = vmatmul.mubr.f32.gmra.mrb[14].mxu0 %v3922_v38 }
  0xc2   : > { %3136 = vmatprep.mubr.f32.mxu0 %v3668_v6  ;;  %v1429_v6 = vld [vmem:[%s4433_s2] sm:$0xff] }
  0xc5   : > { %3137 = vmatmul.mubr.f32.vlgmr.msra.gmra.mrb[0].mxu0 %v3671_v8  ;;  %v1430_v8 = vld [vmem:[%s4433_s2 + $0x8] sm:$0xff] }
  0xc6   : > { %3139 = vmatprep.mubr.f32.mxu0 %v3683_v13  ;;  %v1481_v13 = vand.u32 4294901760, %v1429_v6 }
  0xc8   : > { %v4107_v35 = vsub.f32 %v1429_v6, %v1481_v13 }
  0xc9   : > { %3140 = vmatmul.mubr.f32.gmra.mrb[2].mxu0 %v3696_v21  ;;  %v1484_v21 = vand.u32 4294901760, %v1430_v8 }
  0xca   : > { %3142 = vmatprep.mubr.f32.mxu0 %v3709_v32 }
  0xcb   : > { %v4103_v32 = vpack.c.bf16 %v1484_v21, %v1481_v13  ;;  %v4109_v41 = vsub.f32 %v1430_v8, %v1484_v21 }
  0xcd   : > { %3143 = vmatmul.mubr.f32.gmra.mrb[4].mxu0 %v3730_v44  ;;  %3425 = vmatprep.subr.bf16.mxu1 %v4103_v32  ;;  %v1710_v44 = vand.u32 4294901760, %v4107_v35 }
  0xce   : > { %3145 = vmatprep.mubr.f32.mxu0 %v3736_v47  ;;  %3427 = vmatpush3.bf16.msra.mxu1 %v4103_v32  ;;  %v1717_v47 = vand.u32 4294901760, %v4109_v41 }
  0xcf   : > { %v1711_v53 = vsub.f32 %v4107_v35, %v1710_v44 }
  0xd0   : > { %v1718_v54 = vsub.f32 %v4109_v41, %v1717_v47 }
  0xd1   : > { %3146 = vmatmul.mubr.f32.gmra.mrb[6].mxu0 %v3786_v5  ;;  %v1712_v58 = vand.u32 4294901760, %v1711_v53 }
  0xd2   : > { %3148 = vmatprep.mubr.f32.mxu0 %v3799_v17  ;;  %v1719_v3 = vand.u32 4294901760, %v1718_v54  ;;  %v4121_v17 = vpack.c.bf16 %v4109_v41, %v4107_v35 }
  0xd4   : > { %v3428_v5 = vpack.c.bf16 %v1719_v3, %v1712_v58 }
  0xd5   : > { %3149 = vmatmul.mubr.f32.gmra.mrb[8].mxu0 %v3824_v61 }
  0xd6   : > { %3151 = vmatprep.mubr.f32.mxu0 %v3839_v4  ;;  %3429 = vmatprep.subr.bf16.mxu1 %v3428_v5 }
  0xd9   : > { %3152 = vmatmul.mubr.f32.gmra.mrb[10].mxu0 %v3861_v37 }
  0xda   : > { %3154 = vmatprep.mubr.f32.mxu0 %v3872_v27 }
  0xdd   : > { %3155 = vmatmul.mubr.f32.gmra.mrb[12].mxu0 %v3905_v23 }
  0xde   : > { %3157 = vmatprep.mubr.f32.mxu0 %v3909_v34 }
  0xe1   : > { %3158 = vmatmul.mubr.f32.gmra.mrb[14].mxu0 %v3922_v38 }
 0x198   : > { %v3138_v29 = vpop.f32.mrb[0].mxu0 }
 0x199   : > { %v1436_v61 = vsel %vm1431_vm1, %v3138_v29, 0  ;;  %v1335_v28 = vpop.f32.mrb[1].mxu0 }
 0x19a   : > { %v4124_v37 = vand.u32 4294901760, %v1436_v61  ;;  %v1433_v4 = vsel %vm1431_vm1, %v1335_v28, 0 }
 0x19b   : > { %v4127_v34 = vand.u32 4294901760, %v1433_v4 }
 0x19c   : > { %v4130_v57 = vsub.f32 %v1436_v61, %v4124_v37  ;;  %v3141_v27 = vpop.f32.mrb[2].mxu0 }
 0x19d   : > { %v4133_v22 = vsub.f32 %v1433_v4, %v4127_v34  ;;  %v1442_v40 = vsel %vm1431_vm1, %v3141_v27, 0  ;;  %v1347_v39 = vpop.f32.mrb[3].mxu0 }
 0x19e   : > { %v1559_v14 = vand.u32 4294901760, %v4130_v57  ;;  %v4137_v45 = vand.u32 4294901760, %v1442_v40  ;;  %v1439_v23 = vsel %vm1431_vm1, %v1347_v39, 0 }
 0x19f   : > { %v4140_v18 = vand.u32 4294901760, %v1439_v23  ;;  %v1549_v38 = vand.u32 4294901760, %v4133_v22 }
 0x1a0   : > { %v4144_v55 = vsub.f32 %v1442_v40, %v4137_v45  ;;  %v3144_v49 = vpop.f32.mrb[4].mxu0  ;;  %v1560_v36 = vsub.f32 %v4130_v57, %v1559_v14 }
 0x1a1   : > { %v4150_v62 = vsub.f32 %v1439_v23, %v4140_v18  ;;  %v1448_v7 = vsel %vm1431_vm1, %v3144_v49, 0  ;;  %v1359_v12 = vpop.f32.mrb[5].mxu0  ;;  %v1550_v42 = vsub.f32 %v4133_v22, %v1549_v38 }
 0x1a2   : > { %v1579_v46 = vand.u32 4294901760, %v4144_v55  ;;  %v4157_v50 = vand.u32 4294901760, %v1448_v7  ;;  %v1445_v1 = vsel %vm1431_vm1, %v1359_v12, 0  ;;  %v1561_v11 = vand.u32 4294901760, %v1560_v36 }
 0x1a3   : > { %v1569_v63 = vand.u32 4294901760, %v4150_v62  ;;  %v4161_v19 = vand.u32 4294901760, %v1445_v1  ;;  %v1551_v2 = vand.u32 4294901760, %v1550_v42 }
 0x1a4   : > { %v4164_v15 = vsub.f32 %v1448_v7, %v4157_v50  ;;  %v3147_v24 = vpop.f32.mrb[6].mxu0  ;;  %v1580_v51 = vsub.f32 %v4144_v55, %v1579_v46 }
 0x1a5   : > { %v4170_v9 = vsub.f32 %v1445_v1, %v4161_v19  ;;  %v1454_v60 = vsel %vm1431_vm1, %v3147_v24, 0  ;;  %v1371_v25 = vpop.f32.mrb[7].mxu0  ;;  %3164 = vmatprep.mubr.f32.mxu1 %v1551_v2  ;;  %v1570_v26 = vsub.f32 %v4150_v62, %v1569_v63 }
 0x1a6   : > { %v1599_v52 = vand.u32 4294901760, %v4164_v15  ;;  %v4177_v56 = vand.u32 4294901760, %v1454_v60  ;;  %v1451_v30 = vsel %vm1431_vm1, %v1371_v25, 0  ;;  %3165 = vmatmul.mubr.f32.vlgmr.msra.gmra.mrb[0].mxu1 %v1561_v11  ;;  %v1581_v43 = vand.u32 4294901760, %v1580_v51 }
 0x1a7   : > { %v1589_v33 = vand.u32 4294901760, %v4170_v9  ;;  %v4181_v48 = vand.u32 4294901760, %v1451_v30  ;;  %3431 = vmatpush3.bf16.msra.mxu1 %v3428_v5  ;;  %v1571_v10 = vand.u32 4294901760, %v1570_v26 }
 0x1a8   : > { %v4184_v20 = vsub.f32 %v1454_v60, %v4177_v56  ;;  %v3150_v31 = vpop.f32.mrb[8].mxu0  ;;  %v1600_v59 = vsub.f32 %v4164_v15, %v1599_v52  ;;  %3433 = vmatprep.subr.bf16.mxu1 %v4121_v17 }
 0x1a9   : > { %v4191_v0 = vsub.f32 %v1451_v30, %v4181_v48  ;;  %v1460_v16 = vsel %vm1431_vm1, %v3150_v31, 0  ;;  %v1383_v6 = vpop.f32.mrb[9].mxu0  ;;  %3167 = vmatprep.mubr.f32.mxu1 %v1571_v10  ;;  %v1590_v8 = vsub.f32 %v4170_v9, %v1589_v33 }
 0x1aa   : > { %v1619_v13 = vand.u32 4294901760, %v4184_v20  ;;  %v4198_v21 = vand.u32 4294901760, %v1460_v16  ;;  %v1457_v53 = vsel %vm1431_vm1, %v1383_v6, 0  ;;  %3168 = vmatmul.mubr.f32.gmra.mrb[2].mxu1 %v1581_v43  ;;  %v1601_v61 = vand.u32 4294901760, %v1600_v59 }
 0x1ab   : > { %v1609_v54 = vand.u32 4294901760, %v4191_v0  ;;  %v4202_v58 = vand.u32 4294901760, %v1457_v53  ;;  %v1591_v3 = vand.u32 4294901760, %v1590_v8 }
 0x1ac   : > { %v4205_v5 = vsub.f32 %v1460_v16, %v4198_v21  ;;  %v3153_v29 = vpop.f32.mrb[10].mxu0  ;;  %v1620_v28 = vsub.f32 %v4184_v20, %v1619_v13 }
 0x1ad   : > { %v4211_v4 = vsub.f32 %v1457_v53, %v4202_v58  ;;  %v1466_v27 = vsel %vm1431_vm1, %v3153_v29, 0  ;;  %v1395_v40 = vpop.f32.mrb[11].mxu0  ;;  %3170 = vmatprep.mubr.f32.mxu1 %v1591_v3  ;;  %v1610_v39 = vsub.f32 %v4191_v0, %v1609_v54 }
 0x1ae   : > { %v1639_v23 = vand.u32 4294901760, %v4205_v5  ;;  %v4218_v49 = vand.u32 4294901760, %v1466_v27  ;;  %v1463_v36 = vsel %vm1431_vm1, %v1395_v40, 0  ;;  %3171 = vmatmul.mubr.f32.gmra.mrb[4].mxu1 %v1601_v61  ;;  %v1621_v24 = vand.u32 4294901760, %v1620_v28 }
 0x1af   : > { %v1629_v7 = vand.u32 4294901760, %v4211_v4  ;;  %v4222_v12 = vand.u32 4294901760, %v1463_v36  ;;  %v1611_v42 = vand.u32 4294901760, %v1610_v39 }
 0x1b0   : > { %v4225_v1 = vsub.f32 %v1466_v27, %v4218_v49  ;;  %v3156_v2 = vpop.f32.mrb[12].mxu0  ;;  %v1640_v11 = vsub.f32 %v4205_v5, %v1639_v23 }
 0x1b1   : > { %v4231_v51 = vsub.f32 %v1463_v36, %v4222_v12  ;;  %v1472_v60 = vsel %vm1431_vm1, %v3156_v2, 0  ;;  %v1407_v25 = vpop.f32.mrb[13].mxu0  ;;  %3173 = vmatprep.mubr.f32.mxu1 %v1611_v42  ;;  %v1630_v26 = vsub.f32 %v4211_v4, %v1629_v7 }
 0x1b2   : > { %v1659_v30 = vand.u32 4294901760, %v4225_v1  ;;  %v4238_v10 = vand.u32 4294901760, %v1472_v60  ;;  %v1469_v31 = vsel %vm1431_vm1, %v1407_v25, 0  ;;  %3174 = vmatmul.mubr.f32.gmra.mrb[6].mxu1 %v1621_v24  ;;  %v1641_v53 = vand.u32 4294901760, %v1640_v11 }
 0x1b3   : > { %v1649_v43 = vand.u32 4294901760, %v4231_v51  ;;  %v4242_v59 = vand.u32 4294901760, %v1469_v31  ;;  %v1631_v16 = vand.u32 4294901760, %v1630_v26 }
 0x1b4   : > { %v4245_v6 = vsub.f32 %v1472_v60, %v4238_v10  ;;  %v3159_v8 = vpop.f32.mrb[14].mxu0  ;;  %v1660_v3 = vsub.f32 %v4225_v1, %v1659_v30 }
 0x1b5   : > { %v4251_v29 = vsub.f32 %v1469_v31, %v4242_v59  ;;  %v1478_v61 = vsel %vm1431_vm1, %v3159_v8, 0  ;;  %v1419_v28 = vpop.f32.mrb[15].mxu0  ;;  %3176 = vmatprep.mubr.f32.mxu1 %v1631_v16  ;;  %v1650_v27 = vsub.f32 %v4231_v51, %v1649_v43 }
 0x1b6   : > { %v1679_v40 = vand.u32 4294901760, %v4245_v6  ;;  %v4258_v39 = vand.u32 4294901760, %v1478_v61  ;;  %v1475_v36 = vsel %vm1431_vm1, %v1419_v28, 0  ;;  %3177 = vmatmul.mubr.f32.gmra.mrb[8].mxu1 %v1641_v53  ;;  %v1661_v60 = vand.u32 4294901760, %v1660_v3 }
 0x1b7   : > { %v1669_v42 = vand.u32 4294901760, %v4251_v29  ;;  %v4262_v2 = vand.u32 4294901760, %v1475_v36  ;;  %v1651_v24 = vand.u32 4294901760, %v1650_v27 }
 0x1b8   : > { %v4265_v11 = vsub.f32 %v1478_v61, %v4258_v39  ;;  %v1680_v25 = vsub.f32 %v4245_v6, %v1679_v40 }
 0x1b9   : > { %v4271_v26 = vsub.f32 %v1475_v36, %v4262_v2  ;;  %3179 = vmatprep.mubr.f32.mxu1 %v1651_v24  ;;  %v1670_v31 = vsub.f32 %v4251_v29, %v1669_v42 }
 0x1ba   : > { %v1699_v16 = vand.u32 4294901760, %v4265_v11  ;;  %3180 = vmatmul.mubr.f32.gmra.mrb[10].mxu1 %v1661_v60  ;;  %v1681_v61 = vand.u32 4294901760, %v1680_v25 }
 0x1bb   : > { %v1689_v8 = vand.u32 4294901760, %v4271_v26  ;;  %v1671_v53 = vand.u32 4294901760, %v1670_v31 }
 0x1bc   : > { %v1700_v3 = vsub.f32 %v4265_v11, %v1699_v16 }
 0x1bd   : > { %3182 = vmatprep.mubr.f32.mxu1 %v1671_v53  ;;  %v1690_v28 = vsub.f32 %v4271_v26, %v1689_v8 }
 0x1be   : > { %3183 = vmatmul.mubr.f32.gmra.mrb[12].mxu1 %v1681_v61  ;;  %v1701_v36 = vand.u32 4294901760, %v1700_v3 }
 0x1bf   : > { %v1691_v27 = vand.u32 4294901760, %v1690_v28 }
 0x1c1   : > { %3185 = vmatprep.mubr.f32.mxu1 %v1691_v27 }
 0x1c2   : > { %3186 = vmatmul.mubr.f32.gmra.mrb[14].mxu1 %v1701_v36 }
 0x1c3   : > { %3192 = vmatprep.mubr.f32.mxu1 %v4127_v34 }
 0x1c6   : > { %3193 = vmatmul.mubr.f32.vlgmr.msra.gmra.mrb[0].mxu1 %v4124_v37 }
 0x1c7   : > { %3195 = vmatprep.mubr.f32.mxu1 %v4140_v18  ;;  %3435 = vmatpush3.bf16.msra.mxu1 %v4121_v17  ;;  %v3440_v17 = vpack.c.bf16 %v1717_v47, %v1710_v44 }
 0x1c8   : > { %3437 = vmatprep.subr.bf16.mxu1 %v4103_v32 }
 0x1ca   : > { %3196 = vmatmul.mubr.f32.gmra.mrb[2].mxu1 %v4137_v45 }
 0x1cb   : > { %3198 = vmatprep.mubr.f32.mxu1 %v4161_v19 }
 0x1ce   : > { %3199 = vmatmul.mubr.f32.gmra.mrb[4].mxu1 %v4157_v50 }
 0x1cf   : > { %3201 = vmatprep.mubr.f32.mxu1 %v4181_v48 }
 0x1d2   : > { %3202 = vmatmul.mubr.f32.gmra.mrb[6].mxu1 %v4177_v56 }
 0x1d3   : > { %3204 = vmatprep.mubr.f32.mxu1 %v4202_v58 }
 0x1d6   : > { %3205 = vmatmul.mubr.f32.gmra.mrb[8].mxu1 %v4198_v21 }
 0x1d7   : > { %3207 = vmatprep.mubr.f32.mxu1 %v4222_v12 }
 0x1da   : > { %3208 = vmatmul.mubr.f32.gmra.mrb[10].mxu1 %v4218_v49 }
 0x1db   : > { %3210 = vmatprep.mubr.f32.mxu1 %v4242_v59 }
 0x1de   : > { %3211 = vmatmul.mubr.f32.gmra.mrb[12].mxu1 %v4238_v10 }
 0x1df   : > { %3213 = vmatprep.mubr.f32.mxu1 %v4262_v2 }
 0x1e2   : > { %3214 = vmatmul.mubr.f32.gmra.mrb[14].mxu1 %v4258_v39 }
 0x1e3   : > { %3220 = vmatprep.mubr.f32.mxu1 %v4133_v22 }
 0x1e6   : > { %3221 = vmatmul.mubr.f32.vlgmr.msra.gmra.mrb[0].mxu1 %v4130_v57 }
 0x1e7   : > { %3223 = vmatprep.mubr.f32.mxu1 %v4150_v62  ;;  %3439 = vmatpush3.bf16.msra.mxu1 %v4103_v32 }
 0x1e8   : > { %3441 = vmatprep.subr.bf16.mxu1 %v3440_v17 }
 0x1ea   : > { %3224 = vmatmul.mubr.f32.gmra.mrb[2].mxu1 %v4144_v55 }
 0x1eb   : > { %3226 = vmatprep.mubr.f32.mxu1 %v4170_v9 }
 0x1ee   : > { %3227 = vmatmul.mubr.f32.gmra.mrb[4].mxu1 %v4164_v15 }
 0x1ef   : > { %3229 = vmatprep.mubr.f32.mxu1 %v4191_v0 }
 0x1f2   : > { %3230 = vmatmul.mubr.f32.gmra.mrb[6].mxu1 %v4184_v20 }
 0x1f3   : > { %3232 = vmatprep.mubr.f32.mxu1 %v4211_v4 }
 0x1f6   : > { %3233 = vmatmul.mubr.f32.gmra.mrb[8].mxu1 %v4205_v5 }
 0x1f7   : > { %3235 = vmatprep.mubr.f32.mxu1 %v4231_v51 }
 0x1fa   : > { %3236 = vmatmul.mubr.f32.gmra.mrb[10].mxu1 %v4225_v1 }
 0x1fb   : > { %3238 = vmatprep.mubr.f32.mxu1 %v4251_v29 }
 0x1fe   : > { %3239 = vmatmul.mubr.f32.gmra.mrb[12].mxu1 %v4245_v6 }
 0x1ff   : > { %3241 = vmatprep.mubr.f32.mxu1 %v4271_v26 }
 0x202   : > { %3242 = vmatmul.mubr.f32.gmra.mrb[14].mxu1 %v4265_v11 }
 0x203   : > { %3248 = vmatprep.mubr.f32.mxu1 %v1549_v38 }
 0x206   : > { %3249 = vmatmul.mubr.f32.vlgmr.msra.gmra.mrb[0].mxu1 %v1559_v14 }
 0x207   : > { %3251 = vmatprep.mubr.f32.mxu1 %v1569_v63  ;;  %3443 = vmatpush3.bf16.msra.mxu1 %v3440_v17 }
 0x208   : > { %3445 = vmatprep.subr.bf16.mxu1 %v4103_v32 }
 0x20a   : > { %3252 = vmatmul.mubr.f32.gmra.mrb[2].mxu1 %v1579_v46 }
 0x20b   : > { %3254 = vmatprep.mubr.f32.mxu1 %v1589_v33 }
 0x20e   : > { %3255 = vmatmul.mubr.f32.gmra.mrb[4].mxu1 %v1599_v52 }
 0x20f   : > { %3257 = vmatprep.mubr.f32.mxu1 %v1609_v54 }
 0x212   : > { %3258 = vmatmul.mubr.f32.gmra.mrb[6].mxu1 %v1619_v13 }
 0x213   : > { %3260 = vmatprep.mubr.f32.mxu1 %v1629_v7 }
 0x216   : > { %3261 = vmatmul.mubr.f32.gmra.mrb[8].mxu1 %v1639_v23 }
 0x217   : > { %3263 = vmatprep.mubr.f32.mxu1 %v1649_v43 }
 0x21a   : > { %3264 = vmatmul.mubr.f32.gmra.mrb[10].mxu1 %v1659_v30 }
 0x21b   : > { %3266 = vmatprep.mubr.f32.mxu1 %v1669_v42 }
 0x21e   : > { %3267 = vmatmul.mubr.f32.gmra.mrb[12].mxu1 %v1679_v40 }
 0x21f   : > { %3269 = vmatprep.mubr.f32.mxu1 %v1689_v8 }
 0x222   : > { %3270 = vmatmul.mubr.f32.gmra.mrb[14].mxu1 %v1699_v16 }
 0x223   : > { %3276 = vmatprep.mubr.f32.mxu1 %v4127_v34 }
 0x226   : > { %3277 = vmatmul.mubr.f32.vlgmr.msra.gmra.mrb[0].mxu1 %v4124_v37 }
 0x227   : > { %3279 = vmatprep.mubr.f32.mxu1 %v4140_v18  ;;  %3447 = vmatpush3.bf16.msra.mxu1 %v4103_v32 }
 0x22a   : > { %3280 = vmatmul.mubr.f32.gmra.mrb[2].mxu1 %v4137_v45 }
 0x22b   : > { %3282 = vmatprep.mubr.f32.mxu1 %v4161_v19 }
 0x22e   : > { %3283 = vmatmul.mubr.f32.gmra.mrb[4].mxu1 %v4157_v50 }
 0x22f   : > { %3285 = vmatprep.mubr.f32.mxu1 %v4181_v48 }
 0x232   : > { %3286 = vmatmul.mubr.f32.gmra.mrb[6].mxu1 %v4177_v56 }
 0x233   : > { %3288 = vmatprep.mubr.f32.mxu1 %v4202_v58 }
 0x236   : > { %3289 = vmatmul.mubr.f32.gmra.mrb[8].mxu1 %v4198_v21 }
 0x237   : > { %3291 = vmatprep.mubr.f32.mxu1 %v4222_v12 }
 0x23a   : > { %3292 = vmatmul.mubr.f32.gmra.mrb[10].mxu1 %v4218_v49 }
 0x23b   : > { %3294 = vmatprep.mubr.f32.mxu1 %v4242_v59 }
 0x23e   : > { %3295 = vmatmul.mubr.f32.gmra.mrb[12].mxu1 %v4238_v10 }
 0x23f   : > { %3297 = vmatprep.mubr.f32.mxu1 %v4262_v2 }
 0x242   : > { %3298 = vmatmul.mubr.f32.gmra.mrb[14].mxu1 %v4258_v39 }
 0x243   : > { %3304 = vmatprep.mubr.f32.mxu1 %v4127_v34 }
 0x246   : > { %3305 = vmatmul.mubr.f32.vlgmr.msra.gmra.mrb[0].mxu1 %v4124_v37 }
 0x247   : > { %3307 = vmatprep.mubr.f32.mxu1 %v4140_v18 }
 0x24a   : > { %3308 = vmatmul.mubr.f32.gmra.mrb[2].mxu1 %v4137_v45 }
 0x24b   : > { %3310 = vmatprep.mubr.f32.mxu1 %v4161_v19 }
 0x24e   : > { %3311 = vmatmul.mubr.f32.gmra.mrb[4].mxu1 %v4157_v50 }
 0x24f   : > { %3313 = vmatprep.mubr.f32.mxu1 %v4181_v48 }
 0x252   : > { %3314 = vmatmul.mubr.f32.gmra.mrb[6].mxu1 %v4177_v56 }
 0x253   : > { %3316 = vmatprep.mubr.f32.mxu1 %v4202_v58 }
 0x256   : > { %3317 = vmatmul.mubr.f32.gmra.mrb[8].mxu1 %v4198_v21 }
 0x257   : > { %3319 = vmatprep.mubr.f32.mxu1 %v4222_v12 }
 0x25a   : > { %3320 = vmatmul.mubr.f32.gmra.mrb[10].mxu1 %v4218_v49 }
 0x25b   : > { %3322 = vmatprep.mubr.f32.mxu1 %v4242_v59 }
 0x25e   : > { %3323 = vmatmul.mubr.f32.gmra.mrb[12].mxu1 %v4238_v10 }
 0x25f   : > { %3325 = vmatprep.mubr.f32.mxu1 %v4262_v2 }
 0x262   : > { %3326 = vmatmul.mubr.f32.gmra.mrb[14].mxu1 %v4258_v39 }
 0x319   : > { %v3306_v32 = vpop.f32.mrb[0].mxu1 }
 0x31a   : > { %2586 = vst.msk [vmem:[%s4394_s7 + $0x8] sm:$0xff] %vm2584_vm2, %v3306_v32  ;;  %v2490_v35 = vpop.f32.mrb[1].mxu1 }
 0x31b   : > { %2585 = vst.msk [vmem:[%s4394_s7] sm:$0xff] %vm2584_vm2, %v2490_v35 }
 0x31d   : > { %v3309_v41 = vpop.f32.mrb[2].mxu1 }
 0x31e   : > { %2588 = vst.msk [vmem:[%s4394_s7 + $0x18] sm:$0xff] %vm2584_vm2, %v3309_v41  ;;  %v2502_v44 = vpop.f32.mrb[3].mxu1 }
 0x31f   : > { %2587 = vst.msk [vmem:[%s4394_s7 + $0x10] sm:$0xff] %vm2584_vm2, %v2502_v44 }
 0x321   : > { %v3312_v47 = vpop.f32.mrb[4].mxu1 }
 0x322   : > { %2590 = vst.msk [vmem:[%s4394_s7 + $0x28] sm:$0xff] %vm2584_vm2, %v3312_v47  ;;  %v2514_v37 = vpop.f32.mrb[5].mxu1 }
 0x323   : > { %2589 = vst.msk [vmem:[%s4394_s7 + $0x20] sm:$0xff] %vm2584_vm2, %v2514_v37 }
 0x325   : > { %v3315_v34 = vpop.f32.mrb[6].mxu1 }
 0x326   : > { %2592 = vst.msk [vmem:[%s4394_s7 + $0x38] sm:$0xff] %vm2584_vm2, %v3315_v34  ;;  %v2526_v57 = vpop.f32.mrb[7].mxu1 }
 0x327   : > { %2591 = vst.msk [vmem:[%s4394_s7 + $0x30] sm:$0xff] %vm2584_vm2, %v2526_v57 }
 0x329   : > { %v3318_v22 = vpop.f32.mrb[8].mxu1 }
 0x32a   : > { %2594 = vst.msk [vmem:[%s4394_s7 + $0x48] sm:$0xff] %vm2584_vm2, %v3318_v22  ;;  %v2538_v14 = vpop.f32.mrb[9].mxu1 }
 0x32b   : > { %2593 = vst.msk [vmem:[%s4394_s7 + $0x40] sm:$0xff] %vm2584_vm2, %v2538_v14 }
 0x32d   : > { %v3321_v45 = vpop.f32.mrb[10].mxu1 }
 0x32e   : > { %2596 = vst.msk [vmem:[%s4394_s7 + $0x58] sm:$0xff] %vm2584_vm2, %v3321_v45  ;;  %v2550_v18 = vpop.f32.mrb[11].mxu1 }
 0x32f   : > { %2595 = vst.msk [vmem:[%s4394_s7 + $0x50] sm:$0xff] %vm2584_vm2, %v2550_v18 }
 0x331   : > { %v3324_v38 = vpop.f32.mrb[12].mxu1 }
 0x332   : > { %2598 = vst.msk [vmem:[%s4394_s7 + $0x68] sm:$0xff] %vm2584_vm2, %v3324_v38  ;;  %v2562_v55 = vpop.f32.mrb[13].mxu1 }
 0x333   : > { %2597 = vst.msk [vmem:[%s4394_s7 + $0x60] sm:$0xff] %vm2584_vm2, %v2562_v55 }
 0x335   : > { %v3327_v62 = vpop.f32.mrb[14].mxu1 }
 0x336   : > { %2600 = vst.msk [vmem:[%s4394_s7 + $0x78] sm:$0xff] %vm2584_vm2, %v3327_v62  ;;  %v2574_v46 = vpop.f32.mrb[15].mxu1 }
 0x337   : > { %2599 = vst.msk [vmem:[%s4394_s7 + $0x70] sm:$0xff] %vm2584_vm2, %v2574_v46 }
 0x338 PF: > { %s13_s12 = sadd.s32 1, %s3622_s12  }
 0x339   : > { %p10_p5 = scmp.ge.s32.totalorder %s13_s12, 4  }
 0x33b   :  { %12 = sbr.rel (!%p10_p5) target bundleno = 1 (0x1), region = 62 }

</bundles_post_ra>
